<compile_context>
chip_gen: v6e
topology: v6e:2x2x1
jax: 0.10.0
libtpu: 0.0.40
codegen_flags: <defaults>
</compile_context>

<pallas_src>
import jax
import jax.numpy as jnp
from jax.experimental import pallas as pl
from jax.experimental.pallas import tpu as pltpu

LANE = 128


def _round_up(x, m):
    return ((x + m - 1) // m) * m


def _pad_dim(d):
    # Lane-dense padding.  Realistic (>128) dims go to 256-multiples so the
    # 256-wide MXUs on v6e/v7x are fully fed; tiny dims stay at one lane group.
    return _round_up(d, 256) if d > 128 else _round_up(d, 128)


def _choose_batch_tile(B, batch_tile):
    # bf16 matmul operands -> keep the batch tile a multiple of 16 sublanes.
    tb = max(16, min(_round_up(batch_tile, 16), _round_up(B, 16)))
    # If a single tile would cover the whole batch but the batch is big enough
    # to split, halve it so the "parallel" grid axis has >= 2 steps (v7x
    # megacore gets both TensorCores busy).
    if tb >= B and B > 16:
        tb = _round_up((B + 1) // 2, 16)
    return tb


# --------------------------------------------------------------------------
# Kernel
# --------------------------------------------------------------------------
def vae_kernel(state_ref, eps_ref,
               w_enc_ref, b_enc_ref,
               w_ml_ref, b_ml_ref,
               w_d1_ref, b_d1_ref,
               w_d2_ref, b_d2_ref,
               out_ref, eps_pad_ref):
    """One batch tile of the fused VAE forward.

    Matmul operands are bf16 (MXU throughput + halved weight HBM traffic);
    accumulation and all element-wise math stay in f32.
    """
    l = eps_ref.shape[1]        # true latent size (unpadded stream)
    lp = w_d1_ref.shape[0]      # padded latent size (lane multiple)

    # Widen eps to the padded latent width with explicit zeros.  The zeros
    # matter: padded log_sigma columns are 0 -> sigma = 1, and w_d1's padded
    # rows are 0, so any garbage here would turn into NaN*0 = NaN inside the
    # decoder matmul.  Re-zero every step: with megacore "parallel" scheduling
    # a core may never execute grid step 0, so "zero once" is not safe.
    eps_pad_ref[...] = jnp.zeros_like(eps_pad_ref)
    eps_pad_ref[:, :l] = eps_ref[...]

    x = state_ref[...].astype(jnp.bfloat16)                         # (tb, S)

    # ----- encoder: Linear -> ReLU -----
    h = jnp.dot(x, w_enc_ref[...], preferred_element_type=jnp.float32)
    h = jnp.maximum(h + b_enc_ref[...], 0.0)                        # (tb, Hp)

    # ----- fused [mu | log_sigma] projection (N = 2*Lp, MXU-friendly) -----
    ml = jnp.dot(h.astype(jnp.bfloat16), w_ml_ref[...],
                 preferred_element_type=jnp.float32) + b_ml_ref[...]
    mu = ml[:, :lp]
    log_sigma = ml[:, lp:]

    # ----- reparameterization: z = mu + exp(log_sigma) * eps -----
    z = mu + jnp.exp(log_sigma) * eps_pad_ref[...]                  # (tb, Lp)

    # ----- decoder: Linear -> ReLU -> Linear -> sigmoid -----
    h2 = jnp.dot(z.astype(jnp.bfloat16), w_d1_ref[...],
                 preferred_element_type=jnp.float32)
    h2 = jnp.maximum(h2 + b_d1_ref[...], 0.0)                       # (tb, Hp)

    y = jnp.dot(h2.astype(jnp.bfloat16), w_d2_ref[...],
                preferred_element_type=jnp.float32) + b_d2_ref[...]  # (tb, S)
    out_ref[...] = jax.nn.sigmoid(y).astype(out_ref.dtype)


# --------------------------------------------------------------------------
# Wrapper
# --------------------------------------------------------------------------
def vae_forward(state, eps, packed, *, batch_tile=512, out_dtype=jnp.float32):
    """state: [B, S] f32, eps: [B, L] f32 N(0,1) noise, packed: packed params."""
    B, S = state.shape
    L = eps.shape[1]
    Sd, Hd, Ld = packed["dims"]
    assert S == Sd and L == Ld

    Hp = packed["w_enc"].shape[1]
    Lp = packed["w_d1"].shape[0]

    tb = _choose_batch_tile(B, batch_tile)
    Bp = _round_up(B, tb)
    grid = (Bp // tb,)

    # Only the batch dim is (possibly) padded — features stream unpadded.
    if Bp != B:
        state_in = jnp.zeros((Bp, S), state.dtype).at[:B].set(state)
        eps_in = jnp.zeros((Bp, L), eps.dtype).at[:B].set(eps)
    else:
        state_in, eps_in = state, eps

    weight_keys = ("w_enc", "b_enc", "w_ml", "b_ml", "w_d1", "b_d1", "w_d2", "b_d2")
    weights = tuple(packed[k] for k in weight_keys)

    out_itemsize = jnp.dtype(out_dtype).itemsize
    weight_bytes = sum(int(w.size) * w.dtype.itemsize for w in weights)

    # VMEM budget: 1x resident weights + 3x streamed input tiles + 2x output
    # tiles + eps scratch + live f32 intermediates + headroom.  Cap at 48 MiB
    # on 64-MiB chips (v7x) and ~100 MiB on 128-MiB chips (v5e / v6e).
    stream_bytes = 3 * tb * (S + L) * 4 + 2 * tb * S * out_itemsize
    interm_bytes = 4 * tb * (2 * Hp + 3 * Lp)
    scratch_bytes = tb * Lp * 4
    need = weight_bytes + stream_bytes + interm_bytes + scratch_bytes
    try:
        vmem_cap = int(pltpu.get_tpu_info().vmem_capacity_bytes)
    except Exception:
        vmem_cap = 64 * 1024 * 1024
    budget_cap = (48 << 20) if vmem_cap <= (64 << 20) else (100 << 20)
    vmem_limit = int(min(budget_cap, max(need + (2 << 20), 16 << 20)))

    # Advisory cost on the TRUE (unpadded) dims.
    flops = 2 * B * (Sd * Hd + Hd * 2 * Ld + Ld * Hd + Hd * Sd)
    transcendentals = B * (Ld + Sd)
    bytes_accessed = weight_bytes + B * (Sd + Ld) * 4 + B * Sd * out_itemsize
    cost = pl.CostEstimate(flops=int(flops), transcendentals=int(transcendentals),
                           bytes_accessed=int(bytes_accessed))

    def make_specs(use_buffer_hints):
        def stream(shape, buffers):
            if use_buffer_hints:
                return pl.BlockSpec(shape, lambda i: (i, 0),
                                    pipeline_mode=pl.Buffered(buffers))
            return pl.BlockSpec(shape, lambda i: (i, 0))

        def resident(arr):
            if use_buffer_hints:
                return pl.BlockSpec(arr.shape, lambda i: (0, 0),
                                    pipeline_mode=pl.Buffered(1))
            return pl.BlockSpec(arr.shape, lambda i: (0, 0))

        in_specs = ([stream((tb, S), 3), stream((tb, L), 3)] +
                    [resident(w) for w in weights])
        # Output is written once per step; default double-buffered writeback.
        out_spec = pl.BlockSpec((tb, S), lambda i: (i, 0))
        return in_specs, out_spec

    def run(use_buffer_hints):
        in_specs, out_spec = make_specs(use_buffer_hints)
        fn = pl.pallas_call(
            vae_kernel,
            out_shape=jax.ShapeDtypeStruct((Bp, S), out_dtype),
            grid=grid,
            in_specs=in_specs,
            out_specs=out_spec,
            scratch_shapes=[pltpu.VMEM((tb, Lp), jnp.float32)],
            compiler_params=pltpu.CompilerParams(
                dimension_semantics=("parallel",),     # megacore split on v7x
                vmem_limit_bytes=vmem_limit),
            cost_estimate=cost,
        )
        return jax.block_until_ready(fn(state_in, eps_in, *weights))

    try:
        out = run(True)
    except Exception:
        # Fallback for Pallas builds that reject pipeline_mode buffer hints.
        out = run(False)

    return out[:B] if Bp != B else out


# --------------------------------------------------------------------------
# Parameters (PyTorch nn.Linear default init) + packing
# --------------------------------------------------------------------------
def init_params(key, state_dim, hidden_dim, latent_dim):
    ks = jax.random.split(key, 10)

    def linear(kw, kb, fan_in, fan_out):
        bound = 1.0 / jnp.sqrt(fan_in)
        w = jax.random.uniform(kw, (fan_in, fan_out), jnp.float32, -bound, bound)
        b = jax.random.uniform(kb, (1, fan_out), jnp.float32, -bound, bound)
        return w, b

    w_enc, b_enc = linear(ks[0], ks[1], state_dim, hidden_dim)
    w_mu, b_mu = linear(ks[2], ks[3], hidden_dim, latent_dim)
    w_ls, b_ls = linear(ks[4], ks[5], hidden_dim, latent_dim)
    w_d1, b_d1 = linear(ks[6], ks[7], latent_dim, hidden_dim)
    w_d2, b_d2 = linear(ks[8], ks[9], hidden_dim, state_dim)
    return dict(w_enc=w_enc, b_enc=b_enc, w_mu=w_mu, b_mu=b_mu,
                w_ls=w_ls, b_ls=b_ls, w_d1=w_d1, b_d1=b_d1,
                w_d2=w_d2, b_d2=b_d2)


def pack_params(p, state_dim, hidden_dim, latent_dim):
    """Pad matmul N dims to lane multiples, fuse mu/log_sigma, store weights
    bf16 (biases f32, added post-accumulation).  Contraction over state_dim
    and the final output width stay unpadded so activations stream lane-exact."""
    Hp = _pad_dim(hidden_dim)
    Lp = _pad_dim(latent_dim)

    def pad2(w, r, c):
        return jnp.zeros((r, c), jnp.float32).at[:w.shape[0], :w.shape[1]].set(w)

    w_enc = pad2(p["w_enc"], state_dim, Hp).astype(jnp.bfloat16)   # (S, Hp)
    b_enc = pad2(p["b_enc"], 1, Hp)

    # Fused projection: columns [0, Lp) -> mu, [Lp, 2Lp) -> log_sigma.
    w_ml = jnp.zeros((Hp, 2 * Lp), jnp.float32)
    w_ml = w_ml.at[:hidden_dim, :latent_dim].set(p["w_mu"])
    w_ml = w_ml.at[:hidden_dim, Lp:Lp + latent_dim].set(p["w_ls"])
    b_ml = jnp.zeros((1, 2 * Lp), jnp.float32)
    b_ml = b_ml.at[:, :latent_dim].set(p["b_mu"])
    b_ml = b_ml.at[:, Lp:Lp + latent_dim].set(p["b_ls"])

    # w_d1 padded rows beyond latent_dim MUST stay zero: they absorb the
    # padded z / eps columns in the decoder matmul.
    w_d1 = pad2(p["w_d1"], Lp, Hp).astype(jnp.bfloat16)            # (Lp, Hp)
    b_d1 = pad2(p["b_d1"], 1, Hp)
    w_d2 = pad2(p["w_d2"], Hp, state_dim).astype(jnp.bfloat16)     # (Hp, S)
    b_d2 = pad2(p["b_d2"], 1, state_dim)

    return dict(w_enc=w_enc, b_enc=b_enc,
                w_ml=w_ml.astype(jnp.bfloat16), b_ml=b_ml,
                w_d1=w_d1, b_d1=b_d1, w_d2=w_d2, b_d2=b_d2,
                dims=(state_dim, hidden_dim, latent_dim))


# --------------------------------------------------------------------------
# Pure-JAX reference mirroring the kernel's numerics (bf16 matmuls, f32 else)
# --------------------------------------------------------------------------
def vae_reference(state, eps, packed):
    Lp = packed["w_d1"].shape[0]
    B = state.shape[0]
    L = eps.shape[1]

    def mm(a, w):
        return jnp.dot(a.astype(jnp.bfloat16), w,
                       preferred_element_type=jnp.float32)

    h = jnp.maximum(mm(state, packed["w_enc"]) + packed["b_enc"], 0.0)
    ml = mm(h, packed["w_ml"]) + packed["b_ml"]
    mu, log_sigma = ml[:, :Lp], ml[:, Lp:]
    eps_p = jnp.zeros((B, Lp), jnp.float32).at[:, :L].set(eps)
    z = mu + jnp.exp(log_sigma) * eps_p
    h2 = jnp.maximum(mm(z, packed["w_d1"]) + packed["b_d1"], 0.0)
    y = mm(h2, packed["w_d2"]) + packed["b_d2"]
    return jax.nn.sigmoid(y)


if __name__ == "__main__":
    STATE, HIDDEN, LATENT = 16, 32, 8

    key = jax.random.PRNGKey(0)
    k_params = jax.random.fold_in(key, 0)

    raw_params = init_params(k_params, STATE, HIDDEN, LATENT)
    packed = pack_params(raw_params, STATE, HIDDEN, LATENT)

    # B=8 exercises the padded-batch / single-step path; B=64 exercises a
    # multi-step grid (tb=32, grid=2) and the per-step scratch re-zeroing.
    for B in (8, 64):
        k_s, k_e = jax.random.split(jax.random.fold_in(key, B))
        state = jax.random.normal(k_s, (B, STATE), jnp.float32)
        eps = jax.random.normal(k_e, (B, LATENT), jnp.float32)  # torch.randn stand-in

        out = jax.block_until_ready(vae_forward(state, eps, packed))
        ref = vae_reference(state, eps, packed)

        assert out.shape == (B, STATE)
        err = float(jnp.max(jnp.abs(out - ref)))
        assert jnp.allclose(out, ref, atol=5e-3, rtol=5e-3), (B, err)

    print("KERNEL_OK")
</pallas_src>

<mosaic_0001>
module attributes {stable_mosaic.version = 11 : i64} {
  func.func @vae_kernel(%arg0: i32, %arg1: memref<16x16xf32, #tpu.memory_space<vmem>>, %arg2: memref<16x8xf32, #tpu.memory_space<vmem>>, %arg3: memref<16x128xbf16, #tpu.memory_space<vmem>>, %arg4: memref<1x128xf32, #tpu.memory_space<vmem>>, %arg5: memref<128x256xbf16, #tpu.memory_space<vmem>>, %arg6: memref<1x256xf32, #tpu.memory_space<vmem>>, %arg7: memref<128x128xbf16, #tpu.memory_space<vmem>>, %arg8: memref<1x128xf32, #tpu.memory_space<vmem>>, %arg9: memref<128x16xbf16, #tpu.memory_space<vmem>>, %arg10: memref<1x16xf32, #tpu.memory_space<vmem>>, %arg11: memref<16x16xf32, #tpu.memory_space<vmem>>, %arg12: memref<16x128xf32, #tpu.memory_space<vmem>>) attributes {dimension_semantics = [#tpu.dimension_semantics<parallel>], iteration_bounds = array<i64: 1>, scalar_prefetch = 0 : i64, scratch_operands = 1 : i64, tpu.core_type = #tpu.core_type<tc>, window_params = [{transform_indices = @transform_0, window_bounds = array<i64: 16, 16>}, {transform_indices = @transform_1, window_bounds = array<i64: 16, 8>}, {pipeline_mode = #tpu.pipeline_mode<synchronous>, transform_indices = @transform_2, window_bounds = array<i64: 16, 128>}, {pipeline_mode = #tpu.pipeline_mode<synchronous>, transform_indices = @transform_3, window_bounds = array<i64: 1, 128>}, {pipeline_mode = #tpu.pipeline_mode<synchronous>, transform_indices = @transform_4, window_bounds = array<i64: 128, 256>}, {pipeline_mode = #tpu.pipeline_mode<synchronous>, transform_indices = @transform_5, window_bounds = array<i64: 1, 256>}, {pipeline_mode = #tpu.pipeline_mode<synchronous>, transform_indices = @transform_6, window_bounds = array<i64: 128, 128>}, {pipeline_mode = #tpu.pipeline_mode<synchronous>, transform_indices = @transform_7, window_bounds = array<i64: 1, 128>}, {pipeline_mode = #tpu.pipeline_mode<synchronous>, transform_indices = @transform_8, window_bounds = array<i64: 128, 16>}, {pipeline_mode = #tpu.pipeline_mode<synchronous>, transform_indices = @transform_9, window_bounds = array<i64: 1, 16>}, {transform_indices = @transform_10, window_bounds = array<i64: 16, 16>}]} {
    %cst = arith.constant 0.000000e+00 : f32
    %0 = vector.broadcast %cst : f32 to vector<16x128xf32>
    %c0 = arith.constant 0 : index
    %c0_0 = arith.constant 0 : index
    %1 = vector.load %arg12[%c0, %c0_0] : memref<16x128xf32, #tpu.memory_space<vmem>>, vector<16x128xf32>
    tpu.vector_store %arg12[%c0, %c0_0], %0 {strides = array<i32>} : memref<16x128xf32, #tpu.memory_space<vmem>>, vector<16x128xf32>,
    %c0_1 = arith.constant 0 : index
    %c0_2 = arith.constant 0 : index
    %2 = vector.load %arg2[%c0_1, %c0_2] : memref<16x8xf32, #tpu.memory_space<vmem>>, vector<16x8xf32>
    %c0_3 = arith.constant 0 : index
    %c0_4 = arith.constant 0 : index
    %3 = vector.load %arg12[%c0_3, %c0_4] : memref<16x128xf32, #tpu.memory_space<vmem>>, vector<16x8xf32>
    tpu.vector_store %arg12[%c0_3, %c0_4], %2 {strides = array<i32>} : memref<16x128xf32, #tpu.memory_space<vmem>>, vector<16x8xf32>,
    %c0_5 = arith.constant 0 : index
    %c0_6 = arith.constant 0 : index
    %4 = vector.load %arg1[%c0_5, %c0_6] : memref<16x16xf32, #tpu.memory_space<vmem>>, vector<16x16xf32>
    %5 = arith.truncf %4 : vector<16x16xf32> to vector<16x16xbf16>
    %c0_7 = arith.constant 0 : index
    %c0_8 = arith.constant 0 : index
    %6 = vector.load %arg3[%c0_7, %c0_8] : memref<16x128xbf16, #tpu.memory_space<vmem>>, vector<16x128xbf16>
    %cst_9 = arith.constant dense<0.000000e+00> : vector<16x128xf32>
    %7 = tpu.matmul %5, %6, %cst_9 {dimension_numbers = #tpu.dot_dimension_numbers<[1], [0], [0], [1], [0, 0, 1, 1], [], []>} : vector<16x16xbf16>, vector<16x128xbf16>, vector<16x128xf32> -> vector<16x128xf32>
    %c0_10 = arith.constant 0 : index
    %c0_11 = arith.constant 0 : index
    %8 = vector.load %arg4[%c0_10, %c0_11] : memref<1x128xf32, #tpu.memory_space<vmem>>, vector<1x128xf32>
    %9 = vector.broadcast %8 : vector<1x128xf32> to vector<16x128xf32>
    %10 = arith.addf %7, %9 : vector<16x128xf32>
    %cst_12 = arith.constant 0.000000e+00 : f32
    %11 = vector.broadcast %cst_12 : f32 to vector<16x128xf32>
    %12 = arith.maximumf %10, %11 : vector<16x128xf32>
    %13 = arith.truncf %12 : vector<16x128xf32> to vector<16x128xbf16>
    %c0_13 = arith.constant 0 : index
    %c0_14 = arith.constant 0 : index
    %14 = vector.load %arg5[%c0_13, %c0_14] : memref<128x256xbf16, #tpu.memory_space<vmem>>, vector<128x256xbf16>
    %cst_15 = arith.constant dense<0.000000e+00> : vector<16x256xf32>
    %15 = tpu.matmul %13, %14, %cst_15 {dimension_numbers = #tpu.dot_dimension_numbers<[1], [0], [0], [1], [0, 0, 1, 1], [], []>} : vector<16x128xbf16>, vector<128x256xbf16>, vector<16x256xf32> -> vector<16x256xf32>
    %c0_16 = arith.constant 0 : index
    %c0_17 = arith.constant 0 : index
    %16 = vector.load %arg6[%c0_16, %c0_17] : memref<1x256xf32, #tpu.memory_space<vmem>>, vector<1x256xf32>
    %17 = vector.broadcast %16 : vector<1x256xf32> to vector<16x256xf32>
    %18 = arith.addf %15, %17 : vector<16x256xf32>
    %19 = vector.extract_strided_slice %18 {offsets = [0, 0], sizes = [16, 128], strides = [1, 1]} : vector<16x256xf32> to vector<16x128xf32>
    %20 = vector.extract_strided_slice %18 {offsets = [0, 128], sizes = [16, 128], strides = [1, 1]} : vector<16x256xf32> to vector<16x128xf32>
    %21 = math.exp %20 : vector<16x128xf32>
    %c0_18 = arith.constant 0 : index
    %c0_19 = arith.constant 0 : index
    %22 = vector.load %arg12[%c0_18, %c0_19] : memref<16x128xf32, #tpu.memory_space<vmem>>, vector<16x128xf32>
    %23 = arith.mulf %21, %22 : vector<16x128xf32>
    %24 = arith.addf %19, %23 : vector<16x128xf32>
    %25 = arith.truncf %24 : vector<16x128xf32> to vector<16x128xbf16>
    %c0_20 = arith.constant 0 : index
    %c0_21 = arith.constant 0 : index
    %26 = vector.load %arg7[%c0_20, %c0_21] : memref<128x128xbf16, #tpu.memory_space<vmem>>, vector<128x128xbf16>
    %cst_22 = arith.constant dense<0.000000e+00> : vector<16x128xf32>
    %27 = tpu.matmul %25, %26, %cst_22 {dimension_numbers = #tpu.dot_dimension_numbers<[1], [0], [0], [1], [0, 0, 1, 1], [], []>} : vector<16x128xbf16>, vector<128x128xbf16>, vector<16x128xf32> -> vector<16x128xf32>
    %c0_23 = arith.constant 0 : index
    %c0_24 = arith.constant 0 : index
    %28 = vector.load %arg8[%c0_23, %c0_24] : memref<1x128xf32, #tpu.memory_space<vmem>>, vector<1x128xf32>
    %29 = vector.broadcast %28 : vector<1x128xf32> to vector<16x128xf32>
    %30 = arith.addf %27, %29 : vector<16x128xf32>
    %cst_25 = arith.constant 0.000000e+00 : f32
    %31 = vector.broadcast %cst_25 : f32 to vector<16x128xf32>
    %32 = arith.maximumf %30, %31 : vector<16x128xf32>
    %33 = arith.truncf %32 : vector<16x128xf32> to vector<16x128xbf16>
    %c0_26 = arith.constant 0 : index
    %c0_27 = arith.constant 0 : index
    %34 = vector.load %arg9[%c0_26, %c0_27] : memref<128x16xbf16, #tpu.memory_space<vmem>>, vector<128x16xbf16>
    %cst_28 = arith.constant dense<0.000000e+00> : vector<16x16xf32>
    %35 = tpu.matmul %33, %34, %cst_28 {dimension_numbers = #tpu.dot_dimension_numbers<[1], [0], [0], [1], [0, 0, 1, 1], [], []>} : vector<16x128xbf16>, vector<128x16xbf16>, vector<16x16xf32> -> vector<16x16xf32>
    %c0_29 = arith.constant 0 : index
    %c0_30 = arith.constant 0 : index
    %36 = vector.load %arg10[%c0_29, %c0_30] : memref<1x16xf32, #tpu.memory_space<vmem>>, vector<1x16xf32>
    %37 = vector.broadcast %36 : vector<1x16xf32> to vector<16x16xf32>
    %38 = arith.addf %35, %37 : vector<16x16xf32>
    %39 = arith.negf %38 : vector<16x16xf32>
    %40 = math.exp %39 : vector<16x16xf32>
    %cst_31 = arith.constant 1.000000e+00 : f32
    %41 = vector.broadcast %cst_31 : f32 to vector<16x16xf32>
    %42 = arith.addf %41, %40 : vector<16x16xf32>
    %43 = arith.divf %41, %42 : vector<16x16xf32>
    %c0_32 = arith.constant 0 : index
    %c0_33 = arith.constant 0 : index
    %44 = vector.load %arg11[%c0_32, %c0_33] : memref<16x16xf32, #tpu.memory_space<vmem>>, vector<16x16xf32>
    tpu.vector_store %arg11[%c0_32, %c0_33], %43 {strides = array<i32>} : memref<16x16xf32, #tpu.memory_space<vmem>>, vector<16x16xf32>,
    return
  }
  func.func @transform_0(%arg0: i32) -> (i32, i32) {
    %c0_i32 = arith.constant 0 : i32
    %c0_i32_0 = arith.constant 0 : i32
    return %arg0, %c0_i32 : i32, i32
  }
  func.func @transform_1(%arg0: i32) -> (i32, i32) {
    %c0_i32 = arith.constant 0 : i32
    %c0_i32_0 = arith.constant 0 : i32
    return %arg0, %c0_i32 : i32, i32
  }
  func.func @transform_2(%arg0: i32) -> (i32, i32) {
    %c0_i32 = arith.constant 0 : i32
    %c0_i32_0 = arith.constant 0 : i32
    %c0_i32_1 = arith.constant 0 : i32
    return %c0_i32, %c0_i32_0 : i32, i32
  }
  func.func @transform_3(%arg0: i32) -> (i32, i32) {
    %c0_i32 = arith.constant 0 : i32
    %c0_i32_0 = arith.constant 0 : i32
    %c0_i32_1 = arith.constant 0 : i32
    return %c0_i32, %c0_i32_0 : i32, i32
  }
  func.func @transform_4(%arg0: i32) -> (i32, i32) {
    %c0_i32 = arith.constant 0 : i32
    %c0_i32_0 = arith.constant 0 : i32
    %c0_i32_1 = arith.constant 0 : i32
    return %c0_i32, %c0_i32_0 : i32, i32
  }
  func.func @transform_5(%arg0: i32) -> (i32, i32) {
    %c0_i32 = arith.constant 0 : i32
    %c0_i32_0 = arith.constant 0 : i32
    %c0_i32_1 = arith.constant 0 : i32
    return %c0_i32, %c0_i32_0 : i32, i32
  }
  func.func @transform_6(%arg0: i32) -> (i32, i32) {
    %c0_i32 = arith.constant 0 : i32
    %c0_i32_0 = arith.constant 0 : i32
    %c0_i32_1 = arith.constant 0 : i32
    return %c0_i32, %c0_i32_0 : i32, i32
  }
  func.func @transform_7(%arg0: i32) -> (i32, i32) {
    %c0_i32 = arith.constant 0 : i32
    %c0_i32_0 = arith.constant 0 : i32
    %c0_i32_1 = arith.constant 0 : i32
    return %c0_i32, %c0_i32_0 : i32, i32
  }
  func.func @transform_8(%arg0: i32) -> (i32, i32) {
    %c0_i32 = arith.constant 0 : i32
    %c0_i32_0 = arith.constant 0 : i32
    %c0_i32_1 = arith.constant 0 : i32
    return %c0_i32, %c0_i32_0 : i32, i32
  }
  func.func @transform_9(%arg0: i32) -> (i32, i32) {
    %c0_i32 = arith.constant 0 : i32
    %c0_i32_0 = arith.constant 0 : i32
    %c0_i32_1 = arith.constant 0 : i32
    return %c0_i32, %c0_i32_0 : i32, i32
  }
  func.func @transform_10(%arg0: i32) -> (i32, i32) {
    %c0_i32 = arith.constant 0 : i32
    %c0_i32_0 = arith.constant 0 : i32
    return %arg0, %c0_i32 : i32, i32
  }
}

</mosaic_0001>

<bundles_post_ra>
// kernel: tpu_custom_call.1
= control target key start
LH: loop header
LB: loop body
LE: loop exit
PB: predicated region body
PF: predicated region fallthrough
CT: control target
= control target key end

     0   :  { %15 = vsyncpa [#allocation4], 0  ;;  %s930_s0 = inlined_call_operand.vmem [shape: f32[16,16], index: 0, kind: input, shape index: {}]   ;;  %s931_s1 = inlined_call_operand.vmem [shape: f32[16,8], index: 1, kind: input, shape index: {}]   ;;  %s932_s2 = inlined_call_operand.vmem [shape: bf16[16,128], index: 2, kind: input, shape index: {}]   ;;  %s933_s3 = inlined_call_operand.vmem [shape: f32[1,128], index: 3, kind: input, shape index: {}]   ;;  %s934_s4 = inlined_call_operand.hbm [shape: bf16[128,256], index: 4, kind: input, shape index: {}]   ;;  %s935_s5 = inlined_call_operand.vmem [shape: f32[1,256], index: 5, kind: input, shape index: {}]   ;;  %s936_s6 = inlined_call_operand.vmem [shape: bf16[128,128], index: 6, kind: input, shape index: {}]   ;;  %s937_s7 = inlined_call_operand.vmem [shape: f32[1,128], index: 7, kind: input, shape index: {}]   ;;  %s938_s8 = inlined_call_operand.vmem [shape: bf16[128,16], index: 8, kind: input, shape index: {}]   ;;  %s939_s9 = inlined_call_operand.vmem [shape: f32[1,16], index: 9, kind: input, shape index: {}]   ;;  %s940_s10 = inlined_call_operand.hbm [shape: f32[16,16], index: 10, kind: output, shape index: {}]  }
   0x1   :  { %16 = vsyncpa [#allocation5], 0  ;;  %s753_s13 = smov [#allocation3]  }
   0x2   :  { %s30_s14 = sshll.u32 %s753_s13, 4  ;;  %s31_s14 = int_to_ptr.vmem [resolvable:$true] %s30_s14 }
   0x3   :  { %s717_s15 = scalar_lea.vmem %s31_s14, 2048  ;;  %p722_p1 = scmp.lt.s32.totalorder %s31_s14, %s31_s14 }
   0x4   :  { %p718_p0 = scmp.ne.s32.totalorder %s31_s14, %s717_s15  ;;  %p723_p2 = scmp.lt.s32.totalorder %s717_s15, %s717_s15 }
   0x6   :  { %p724_p3 = por %p723_p2, %p722_p1 }
   0x8   :  { %p725_p4 = pnand %p724_p3, %p718_p0 }
   0xa   :  { %728 = shalt.err (!%p725_p4)
}
   0xb   :  { %s754_s16 = smov 128   ;;  %s755_s17 = smov 8  }
   0xc   :  { %36 = dma.hbm_to_vmem [thread:$0]  %s934_s4, 2048, %s31_s14, [#allocation4], %s754_s16, %s754_s16, %s755_s17  }
   0xd   :  { %749 = dma.done.wait [#allocation4], 2048  }
   0xe   :  { %750 = vsyncadd [#allocation4], 4294965248  ;;  %v756_v0 = vmov 0.0   ;;  %vm757_vm0 = vmmov 0   ;;  %v656_v1 = vld [vmem:[%s932_s2] sm:$0xff]   ;;  %v59_v3 = vld [vmem:[%s930_s0 + $0x8] sm:$0xff]  ;;  %v142_v47 = vlaneseq }
   0xf   :  { %603 = vmatprep.subr.bf16.mxu0 %v756_v0  ;;  %51 = vst [vmem:[#allocation2] sm:$0xff] %v756_v0  ;;  %52 = vst [vmem:[#allocation2 + $0x8] sm:$0xff] %v756_v0  ;;  %605 = vmatprep.mubr.msk.bf16.mxu0 %vm757_vm0, %v756_v0  ;;  %v58_v2 = vld [vmem:[%s930_s0] sm:$0xff]  ;;  %vm76_vm1 = vcmask 130048   ;;  %v660_v7 = vld [vmem:[#allocation3 + $0x64] ss:$8 sps:$4 sm:$0xff]  }
  0x10   :  { %604 = vmatpush3.bf16.msra.mxu0 %v656_v1  ;;  %v60_v4 = vpack.c.bf16 %v59_v3, %v58_v2  ;;  %v657_v5 = vld [vmem:[#allocation3 + $0x74] ss:$8 sps:$4 sm:$0xff]   ;;  %v659_v6 = vld [vmem:[#allocation3 + $0x70] ss:$8 sps:$4 sm:$0xff]   ;;  %v662_v8 = vld [vmem:[#allocation3 + $0x60] ss:$8 sps:$4 sm:$0xff]  }
  0x11   :  { %609 = vmatprep.subr.bf16.mxu0 %v756_v0  ;;  %232 = vmatprep.subr.bf16.mxu1 %v657_v5  ;;  %v663_v9 = vld [vmem:[#allocation3 + $0x54] ss:$8 sps:$4 sm:$0xff]   ;;  %v665_v10 = vld [vmem:[#allocation3 + $0x50] ss:$8 sps:$4 sm:$0xff]   ;;  %v666_v11 = vld [vmem:[#allocation3 + $0x44] ss:$8 sps:$4 sm:$0xff]  }
  0x12   :  { %233 = vmatpush1.bf16.msra.mxu1 %v659_v6  ;;  %v668_v12 = vld [vmem:[#allocation3 + $0x40] ss:$8 sps:$4 sm:$0xff]   ;;  %v669_v13 = vld [vmem:[#allocation3 + $0x34] ss:$8 sps:$4 sm:$0xff]   ;;  %v671_v14 = vld [vmem:[#allocation3 + $0x30] ss:$8 sps:$4 sm:$0xff]  }
  0x13   :  { %606 = vmatmul.mubr.msk.bf16.vlgmr.msra.gmra.mxu0 %vm76_vm1, %v60_v4  ;;  %234 = vmatprep.subr.bf16.mxu1 %v660_v7  ;;  %v672_v15 = vld [vmem:[#allocation3 + $0x24] ss:$8 sps:$4 sm:$0xff]   ;;  %v674_v16 = vld [vmem:[#allocation3 + $0x20] ss:$8 sps:$4 sm:$0xff]   ;;  %v675_v17 = vld [vmem:[#allocation3 + $0x14] ss:$8 sps:$4 sm:$0xff]  }
  0x14   :  { %625 = vmatprep.mubr.msk.bf16.mxu0 %vm757_vm0, %v756_v0  ;;  %v677_v18 = vld [vmem:[#allocation3 + $0x10] ss:$8 sps:$4 sm:$0xff]   ;;  %v678_v19 = vld [vmem:[#allocation3 + $0x4] ss:$8 sps:$4 sm:$0xff]   ;;  %v680_v20 = vld [vmem:[#allocation3] ss:$8 sps:$4 sm:$0xff]  }
  0x15   :  { %v758_v21 = vmov 0   ;;  %v544_v22 = vld [vmem:[%s933_s3] ss:$0 sm:$0xff]  ;;  %v681_v32 = vld [vmem:[%s936_s6 + $0x38] sm:$0xff]   ;;  %v682_v33 = vld [vmem:[%s936_s6 + $0x30] sm:$0xff]   ;;  %vm55_vm2 = vcmask 64512  }
  0x16   :  { %235 = vmatpush1.bf16.msra.mxu1 %v662_v8  ;;  %264 = vmatprep.mubr.bf16.mxu1 %v758_v21  ;;  %v683_v34 = vld [vmem:[%s936_s6 + $0x28] sm:$0xff]   ;;  %v684_v35 = vld [vmem:[%s936_s6 + $0x20] sm:$0xff]   ;;  %v685_v36 = vld [vmem:[%s936_s6 + $0x18] sm:$0xff]   ;;  %v143_v48 = vshrl.u32 %v142_v47, 7 }
  0x17   :  { %236 = vmatprep.subr.bf16.mxu1 %v663_v9  ;;  %610 = vmatpush3.bf16.msra.mxu0 %v681_v32  ;;  %v53_v37 = vld [vmem:[%s931_s1] sm:$0xff]  ;;  %v54_v38 = vld [vmem:[%s931_s1 + $0x8] sm:$0xff]  ;;  %v686_v39 = vld [vmem:[%s936_s6 + $0x10] sm:$0xff]  }
  0x18   :  { %611 = vmatprep.subr.bf16.mxu0 %v756_v0  ;;  %56 = vst.msk [vmem:[#allocation2] sm:$0xff] %vm55_vm2, %v53_v37  ;;  %57 = vst.msk [vmem:[#allocation2 + $0x8] sm:$0xff] %vm55_vm2, %v54_v38  ;;  %v687_v40 = vld [vmem:[%s936_s6 + $0x8] sm:$0xff]   ;;  %v688_v41 = vld [vmem:[%s936_s6] sm:$0xff]   ;;  %v148_v49 = vsub.s32 1, %v143_v48  ;;  %v144_v60 = vsub.s32 0, %v143_v48 }
  0x19   :  { %v689_v42 = vld [vmem:[%s938_s8 + $0x38] sm:$0xff]   ;;  %v690_v43 = vld [vmem:[%s938_s8 + $0x30] sm:$0xff]   ;;  %v691_v44 = vld [vmem:[%s938_s8 + $0x28] sm:$0xff]  }
  0x1a   :  { %237 = vmatpush1.bf16.msra.mxu1 %v665_v10  ;;  %v692_v45 = vld [vmem:[%s938_s8 + $0x20] sm:$0xff]   ;;  %v693_v46 = vld [vmem:[%s938_s8 + $0x18] sm:$0xff]   ;;  %v694_v10 = vld [vmem:[%s938_s8 + $0x10] sm:$0xff]  }
  0x1b   :  { %238 = vmatprep.subr.bf16.mxu1 %v666_v11  ;;  %612 = vmatpush3.bf16.msra.mxu0 %v682_v33  ;;  %v140_v50 = vld [vmem:[%s935_s5] sm:$0x3]  ;;  %v695_v11 = vld [vmem:[%s938_s8 + $0x8] sm:$0xff]  }
  0x1c   :  { %613 = vmatprep.subr.bf16.mxu0 %v756_v0  ;;  %v149_v51 = vrot.slane %v140_v50, %v148_v49  ;;  %v145_v63 = vrot.slane %v140_v50, %v144_v60 }
  0x1e   :  { %239 = vmatpush1.bf16.msra.mxu1 %v668_v12  ;;  %v696_v12 = vld [vmem:[%s938_s8] sm:$0xff]  }
  0x1f   :  { %240 = vmatprep.subr.bf16.mxu1 %v669_v13  ;;  %614 = vmatpush3.bf16.msra.mxu0 %v683_v34  ;;  %v279_v62 = vld [vmem:[#allocation2] sm:$0xff]  ;;  %v280_v1 = vld [vmem:[#allocation2 + $0x8] sm:$0xff] }
  0x20   :  { %615 = vmatprep.subr.bf16.mxu0 %v756_v0  ;;  %v563_v13 = vld [vmem:[%s937_s7] ss:$0 sm:$0xff]  ;;  %s759_s7 = smov [#allocation6]  }
  0x21   :  { %s532_s8 = sshll.u32 %s759_s7, 4  ;;  %s533_s8 = int_to_ptr.vmem [resolvable:$true] %s532_s8 }
  0x22   :  { %241 = vmatpush1.bf16.msra.mxu1 %v671_v14  ;;  %p734_p6 = scmp.lt.s32.totalorder %s533_s8, %s533_s8 }
  0x23   :  { %242 = vmatprep.subr.bf16.mxu1 %v672_v15  ;;  %616 = vmatpush3.bf16.msra.mxu0 %v684_v35 }
  0x24   :  { %617 = vmatprep.subr.bf16.mxu0 %v756_v0 }
  0x26   :  { %243 = vmatpush1.bf16.msra.mxu1 %v674_v16 }
  0x27   :  { %244 = vmatprep.subr.bf16.mxu1 %v675_v17  ;;  %618 = vmatpush3.bf16.msra.mxu0 %v685_v36 }
  0x28   :  { %619 = vmatprep.subr.bf16.mxu0 %v756_v0 }
  0x2a   :  { %245 = vmatpush1.bf16.msra.mxu1 %v677_v18 }
  0x2b   :  { %246 = vmatprep.subr.bf16.mxu1 %v678_v19  ;;  %620 = vmatpush3.bf16.msra.mxu0 %v686_v39 }
  0x2c   :  { %621 = vmatprep.subr.bf16.mxu0 %v756_v0 }
  0x2e   :  { %247 = vmatpush1.bf16.msra.mxu1 %v680_v20 }
  0x2f   :  { %629 = vmatprep.subr.bf16.mxu1 %v756_v0  ;;  %622 = vmatpush3.bf16.msra.mxu0 %v687_v40 }
  0x30   :  { %623 = vmatprep.subr.bf16.mxu0 %v756_v0 }
  0x33   :  { %624 = vmatpush3.bf16.msra.mxu0 %v688_v41 }
  0xd3   :  { %v114_v23 = vpop.f32.mrf.mxu0 }
  0xd4   :  { %v115_v25 = vadd.f32 %v544_v22, %v114_v23 }
  0xd5   :  { %v607_v24 = vpop.f32.mrf.mxu0 }
  0xd6   :  { %v121_v29 = vmax.f32 %v115_v25, 0.0 }
  0xd7   :  { %v117_v26 = vpop.f32.mrf.mxu0 }
  0xd8   :  { %v118_v27 = vadd.f32 %v544_v22, %v117_v26 }
  0xd9   :  { %v608_v28 = vpop.f32.mrf.mxu0 }
  0xda   :  { %v122_v30 = vmax.f32 %v118_v27, 0.0 }
  0xdc   :  { %v123_v31 = vpack.c.bf16 %v122_v30, %v121_v29 }
  0xde   :  { %265 = vmatmul.mubr.bf16.vlgmr.msra.gmra.mxu1 %v123_v31 }
  0xdf   :  { %645 = vmatprep.mubr.msk.bf16.mxu1 %vm757_vm0, %v756_v0  ;;  %630 = vmatpush3.bf16.msra.mxu1 %v689_v42 }
  0xe0   :  { %631 = vmatprep.subr.bf16.mxu1 %v756_v0 }
  0xe3   :  { %632 = vmatpush3.bf16.msra.mxu1 %v690_v43 }
  0xe4   :  { %633 = vmatprep.subr.bf16.mxu1 %v756_v0 }
  0xe7   :  { %634 = vmatpush3.bf16.msra.mxu1 %v691_v44 }
  0xe8   :  { %635 = vmatprep.subr.bf16.mxu1 %v756_v0 }
  0xeb   :  { %636 = vmatpush3.bf16.msra.mxu1 %v692_v45 }
  0xec   :  { %637 = vmatprep.subr.bf16.mxu1 %v756_v0 }
  0xef   :  { %638 = vmatpush3.bf16.msra.mxu1 %v693_v46 }
  0xf0   :  { %639 = vmatprep.subr.bf16.mxu1 %v756_v0 }
  0xf3   :  { %640 = vmatpush3.bf16.msra.mxu1 %v694_v10 }
  0xf4   :  { %641 = vmatprep.subr.bf16.mxu1 %v756_v0 }
  0xf7   :  { %642 = vmatpush3.bf16.msra.mxu1 %v695_v11 }
  0xf8   :  { %643 = vmatprep.subr.bf16.mxu1 %v756_v0  ;;  %v572_v0 = vld [vmem:[%s939_s9] ss:$0 sm:$0xff]  ;;  %s729_s9 = scalar_lea.vmem %s533_s8, 256 }
  0xf9   :  { %p730_p5 = scmp.ne.s32.totalorder %s533_s8, %s729_s9  ;;  %p735_p7 = scmp.lt.s32.totalorder %s729_s9, %s729_s9 }
  0xfb   :  { %644 = vmatpush3.bf16.msra.mxu1 %v696_v12  ;;  %p736_p8 = por %p735_p7, %p734_p6 }
  0xfd   :  { %p737_p9 = pnand %p736_p8, %p730_p5 }
 0x19e   :  { %v266_v52 = vpop.f32.mrf.mxu1 }
 0x19f   :  { %v267_v4 = vadd.f32 %v266_v52, %v145_v63 }
 0x1a0   :  { %v268_v53 = vpop.f32.mrf.mxu1 }
 0x1a1   :  { %v269_v54 = vadd.f32 %v268_v53, %v149_v51 }
 0x1a2   :  { %v270_v55 = vpop.f32.mrf.mxu1 }
 0x1a3   :  { %v275_v56 = vmul.f32 1.442695, %v269_v54  ;;  %v271_v5 = vadd.f32 %v270_v55, %v145_v63 }
 0x1a4   :  { %v272_v57 = vpop.f32.mrf.mxu1 }
 0x1a5   :  { %697 = vpow2.f32 %v275_v56  ;;  %v273_v58 = vadd.f32 %v272_v57, %v149_v51 }
 0x1a7   :  { %v277_v59 = vmul.f32 1.442695, %v273_v58 }
 0x1a9   :  { %699 = vpow2.f32 %v277_v59 }
 0x1b2   :  { %v698_v61 = vpop.eup %697 }
 0x1b3   :  { %v281_v2 = vmul.f32 %v698_v61, %v279_v62 }
 0x1b5   :  { %v283_v7 = vadd.f32 %v281_v2, %v267_v4 }
 0x1b6   :  { %v700_v3 = vpop.eup %699 }
 0x1b7   :  { %v282_v6 = vmul.f32 %v700_v3, %v280_v1 }
 0x1b9   :  { %v284_v8 = vadd.f32 %v282_v6, %v271_v5 }
 0x1bb   :  { %v285_v9 = vpack.c.bf16 %v284_v8, %v283_v7 }
 0x1bd   :  { %626 = vmatmul.mubr.bf16.vlgmr.msra.gmra.mxu0 %v285_v9 }
 0x27d   :  { %v391_v14 = vpop.f32.mrf.mxu0 }
 0x27e   :  { %v392_v16 = vadd.f32 %v563_v13, %v391_v14 }
 0x27f   :  { %v627_v15 = vpop.f32.mrf.mxu0 }
 0x280   :  { %v398_v20 = vmax.f32 %v392_v16, 0.0 }
 0x281   :  { %v394_v17 = vpop.f32.mrf.mxu0 }
 0x282   :  { %v395_v18 = vadd.f32 %v563_v13, %v394_v17 }
 0x283   :  { %v628_v19 = vpop.f32.mrf.mxu0 }
 0x284   :  { %v399_v21 = vmax.f32 %v395_v18, 0.0 }
 0x286   :  { %v400_v22 = vpack.c.bf16 %v399_v21, %v398_v20 }
 0x288   :  { %646 = vmatmul.mubr.bf16.vlgmr.msra.gmra.mxu1 %v400_v22 }
 0x348   :  { %v506_v23 = vpop.f32.mrf.mxu1 }
 0x349   :  { %v507_v24 = vadd.f32 %v572_v0, %v506_v23 }
 0x34a   :  { %v647_v25 = vpop.f32.mrf.mxu1 }
 0x34b   :  { %v581_v26 = vmul.f32 -1.442695, %v507_v24 }
 0x34c   :  { %v509_v27 = vpop.f32.mrf.mxu1 }
 0x34d   :  { %701 = vpow2.f32 %v581_v26  ;;  %v510_v28 = vadd.f32 %v572_v0, %v509_v27 }
 0x34e   :  { %v648_v29 = vpop.f32.mrf.mxu1 }
 0x34f   :  { %v582_v30 = vmul.f32 -1.442695, %v510_v28 }
 0x351   :  { %703 = vpow2.f32 %v582_v30 }
 0x35a   :  { %v702_v31 = vpop.eup %701 }
 0x35b   :  { %v519_v32 = vadd.f32 1.0, %v702_v31 }
 0x35d   :  { %705 = vrcp.f32 %v519_v32 }
 0x35e   :  { %v704_v33 = vpop.eup %703 }
 0x35f   :  { %v520_v34 = vadd.f32 1.0, %v704_v33 }
 0x361   :  { %707 = vrcp.f32 %v520_v34 }
 0x36a   :  { %v706_v35 = vpop.eup %705 }
 0x36b   :  { %525 = vst.msk [vmem:[#allocation6] sm:$0xff] %vm76_vm1, %v706_v35 }
 0x36e   :  { %v708_v36 = vpop.eup %707 }
 0x36f   :  { %526 = vst.msk [vmem:[#allocation6 + $0x8] sm:$0xff] %vm76_vm1, %v708_v36 }
 0x370   :  { %740 = shalt.err (!%p737_p9)
}
 0x371   :  { %538 = dma.vmem_to_hbm [thread:$0]  %s533_s8, 256, %s940_s10, [#allocation5], %s754_s16, %s754_s16, %s755_s17  }
 0x372   :  { %751 = dma.done.wait [#allocation5], 256  }
 0x373   :  { %752 = vsyncadd [#allocation5], 4294967040 }
 0x374   :  { %542 = vsyncpa [#allocation4], 1 }
 0x375   :  { %543 = vsyncpa [#allocation5], 1 }

</bundles_post_ra>
